<compile_context>
chip_gen: v7x
topology: tpu7x:2x2x1
jax: 0.10.0
libtpu: 0.0.40
codegen_flags: <defaults>
</compile_context>

<pallas_src>
import jax
import jax.numpy as jnp
from jax.experimental import pallas as pl
from jax.experimental.pallas import tpu as pltpu

IN_DIM = 1024
HID_DIM = 128
CODE_DIM = 10
BN_EPS = 1e-5
LEAKY_SLOPE = 0.2


def _round_up(n, m):
    return ((n + m - 1) // m) * m


def _vmem_limit(bytes_needed):
    # 1.5x headroom + 2 MiB for compiler internals; capped well under the
    # v7x physical VMEM ceiling (64 MiB).
    return min(int(bytes_needed * 1.5) + (2 << 20), 56 << 20)


# ---------------------------------------------------------------------------
# Call 1: per-tile fc matmul + partial BN statistics.
# ---------------------------------------------------------------------------
def stats_matmul_kernel(x_ref, w1_ref, y_ref, stats_ref):
    # fc: Linear(1024 -> 128), bias omitted (cancelled by training-mode BN).
    # bf16 inputs on the MXU, f32 accumulation.
    y = jnp.dot(x_ref[...].astype(jnp.bfloat16), w1_ref[...],
                preferred_element_type=jnp.float32)          # (bt, 128) f32
    y_ref[...] = y
    # Per-tile partial statistics.  Zero-padded rows (no bias) contribute
    # exactly 0 to both sums, so ragged batches stay exact.
    stats_ref[0, 0:1, :] = jnp.sum(y, axis=0, keepdims=True)
    stats_ref[0, 1:2, :] = jnp.sum(y * y, axis=0, keepdims=True)


# ---------------------------------------------------------------------------
# Call 2: fused BN scale/shift + LeakyReLU + fc1.
# ---------------------------------------------------------------------------
def bn_act_fc1_kernel(y_ref, scale_ref, shift_ref, w2_ref, b2_ref, a_ref, b_ref):
    a = y_ref[...] * scale_ref[...] + shift_ref[...]
    a = jnp.maximum(a, LEAKY_SLOPE * a)                       # LeakyReLU(0.2)
    a_ref[...] = a.astype(a_ref.dtype)
    # fc1: Linear(128 -> 10).  Tiny matmul; f32 for precision, narrow store.
    b = jnp.dot(a, w2_ref[...], preferred_element_type=jnp.float32) + b2_ref[...]
    b_ref[...] = b.astype(b_ref.dtype)


def prepare_params(params):
    """One-time weight preparation (hoisted out of the per-call path).
    params['b1'] is intentionally unused (training-mode BN cancels it)."""
    return {
        "w1_t": params["w1"].T.astype(jnp.bfloat16),                 # (1024, 128)
        "gamma": params["gamma"].reshape(1, HID_DIM).astype(jnp.float32),
        "beta": params["beta"].reshape(1, HID_DIM).astype(jnp.float32),
        "w2_t": params["w2"].T.astype(jnp.float32),                  # (128, 10)
        "b2": params["b2"].reshape(1, CODE_DIM).astype(jnp.float32),
    }


def latent_predictor(x, prepared, *, block_rows=512):
    """x: (B, 1024). prepared: output of prepare_params. Returns (a, b)."""
    assert block_rows % 8 == 0 and block_rows <= 2048
    B = x.shape[0]
    bt = min(block_rows, _round_up(B, 8))          # batch-tile rows (mult. of 8)
    b_pad = _round_up(B, bt)
    nt = b_pad // bt
    if b_pad != B:
        # Zero rows contribute 0 to sum/sumsq (no fc bias), so stats stay exact.
        x = jnp.pad(x, ((0, b_pad - B), (0, 0)))
    x_bytes = x.dtype.itemsize

    # ---- call 1: matmul + partial stats -----------------------------------
    vmem1 = (2 * bt * IN_DIM * x_bytes          # x blocks (double-buffered)
             + 2 * IN_DIM * HID_DIM * 2         # w1 (bf16)
             + 2 * bt * HID_DIM * 4             # y out blocks
             + 2 * 2 * HID_DIM * 4)             # stats out blocks
    cost1 = pl.CostEstimate(
        flops=2 * b_pad * IN_DIM * HID_DIM + 4 * b_pad * HID_DIM,
        transcendentals=0,
        bytes_accessed=(x_bytes * b_pad * IN_DIM + 2 * IN_DIM * HID_DIM
                        + 4 * b_pad * HID_DIM + 4 * nt * 2 * HID_DIM))
    y, stats = pl.pallas_call(
        stats_matmul_kernel,
        out_shape=(jax.ShapeDtypeStruct((b_pad, HID_DIM), jnp.float32),
                   jax.ShapeDtypeStruct((nt, 2, HID_DIM), jnp.float32)),
        grid_spec=pltpu.PrefetchScalarGridSpec(
            num_scalar_prefetch=0,
            grid=(nt,),
            in_specs=[
                pl.BlockSpec((bt, IN_DIM), lambda t: (t, 0)),
                pl.BlockSpec((IN_DIM, HID_DIM), lambda t: (0, 0)),
            ],
            out_specs=(
                pl.BlockSpec((bt, HID_DIM), lambda t: (t, 0)),
                pl.BlockSpec((1, 2, HID_DIM), lambda t: (t, 0, 0)),
            ),
        ),
        compiler_params=pltpu.CompilerParams(
            dimension_semantics=("parallel",),
            vmem_limit_bytes=_vmem_limit(vmem1)),
        cost_estimate=cost1,
    )(x, prepared["w1_t"])

    # ---- BN fused scale/shift from partial sums (128 values, plain JAX) ---
    # Single-pass variance E[y^2]-E[y]^2; fine for BN-scale inputs, clamped >=0.
    total = jnp.sum(stats, axis=0)                          # (2, 128)
    mean = total[0:1] / B
    var = jnp.maximum(total[1:2] / B - mean * mean, 0.0)    # biased variance
    scale = prepared["gamma"] * jax.lax.rsqrt(var + BN_EPS)
    shift = prepared["beta"] - mean * scale

    # ---- call 2: normalize + LeakyReLU + fc1 ------------------------------
    vmem2 = (2 * bt * HID_DIM * 4                # y in
             + 4 * HID_DIM * 4 * 2               # scale, shift
             + 2 * (HID_DIM * CODE_DIM + CODE_DIM) * 4   # w2, b2
             + 2 * bt * HID_DIM * 4              # a out
             + 2 * bt * CODE_DIM * 4)            # b out
    cost2 = pl.CostEstimate(
        flops=2 * b_pad * HID_DIM * CODE_DIM + 4 * b_pad * HID_DIM,
        transcendentals=0,
        bytes_accessed=4 * (2 * b_pad * HID_DIM + b_pad * CODE_DIM
                            + HID_DIM * CODE_DIM + 4 * HID_DIM))
    a_full, b_full = pl.pallas_call(
        bn_act_fc1_kernel,
        out_shape=(jax.ShapeDtypeStruct((b_pad, HID_DIM), jnp.float32),
                   jax.ShapeDtypeStruct((b_pad, CODE_DIM), jnp.float32)),
        grid_spec=pltpu.PrefetchScalarGridSpec(
            num_scalar_prefetch=0,
            grid=(nt,),
            in_specs=[
                pl.BlockSpec((bt, HID_DIM), lambda t: (t, 0)),
                pl.BlockSpec((1, HID_DIM), lambda t: (0, 0)),
                pl.BlockSpec((1, HID_DIM), lambda t: (0, 0)),
                pl.BlockSpec((HID_DIM, CODE_DIM), lambda t: (0, 0)),
                pl.BlockSpec((1, CODE_DIM), lambda t: (0, 0)),
            ],
            out_specs=(
                pl.BlockSpec((bt, HID_DIM), lambda t: (t, 0)),
                pl.BlockSpec((bt, CODE_DIM), lambda t: (t, 0)),
            ),
        ),
        compiler_params=pltpu.CompilerParams(
            dimension_semantics=("parallel",),
            vmem_limit_bytes=_vmem_limit(vmem2)),
        cost_estimate=cost2,
    )(y, scale, shift, prepared["w2_t"], prepared["b2"])

    if b_pad != B:
        return a_full[:B], b_full[:B]
    return a_full, b_full


def init_params(key):
    """Deterministic init mimicking utils.initialize_weights:
       Linear: weight ~ N(0, 0.02), bias = 0
       BatchNorm: weight ~ N(1, 0.02), bias = 0"""
    k1, k2, k3 = jax.random.split(key, 3)
    return {
        "w1": 0.02 * jax.random.normal(k1, (HID_DIM, IN_DIM), jnp.float32),
        "b1": jnp.zeros((HID_DIM,), jnp.float32),
        "gamma": 1.0 + 0.02 * jax.random.normal(k2, (HID_DIM,), jnp.float32),
        "beta": jnp.zeros((HID_DIM,), jnp.float32),
        "w2": 0.02 * jax.random.normal(k3, (CODE_DIM, HID_DIM), jnp.float32),
        "b2": jnp.zeros((CODE_DIM,), jnp.float32),
    }


def reference(x, params):
    """Pure-JAX f32 reference of the PyTorch forward (training-mode BN, with b1)."""
    y = x @ params["w1"].T + params["b1"]
    mean = jnp.mean(y, axis=0, keepdims=True)
    var = jnp.mean((y - mean) ** 2, axis=0, keepdims=True)
    y = (y - mean) / jnp.sqrt(var + BN_EPS)
    y = y * params["gamma"] + params["beta"]
    a = jnp.where(y > 0, y, LEAKY_SLOPE * y)
    b = a @ params["w2"].T + params["b2"]
    return a, b


if __name__ == "__main__":
    key = jax.random.PRNGKey(0)
    kx, kp, kb, kx2 = jax.random.split(key, 4)
    params = init_params(kp)

    # Tolerances are loosened vs the pure-f32 reference because the fc matmul
    # runs in bf16 on the MXU (f32 accumulation).
    TOL = dict(atol=3e-2, rtol=3e-2)

    # Test 1: small batch, single tile, no padding (b_pad == B -> no slicing).
    B = 8
    x = jax.random.normal(kx, (B, IN_DIM), jnp.float32)
    prepared = prepare_params(params)
    a, b = latent_predictor(x, prepared)
    jax.block_until_ready((a, b))
    a_ref, b_ref = reference(x, params)
    assert a.shape == (B, HID_DIM) and b.shape == (B, CODE_DIM)
    assert jnp.allclose(a, a_ref, **TOL)
    assert jnp.allclose(b, b_ref, **TOL)

    # Test 2: nonzero fc bias (verifies the BN cancellation), multiple batch
    # tiles, cross-tile stats reduction, and the ragged-batch padding path.
    params2 = dict(params)
    params2["b1"] = 0.1 * jax.random.normal(kb, (HID_DIM,), jnp.float32)
    B2 = 40
    x2 = jax.random.normal(kx2, (B2, IN_DIM), jnp.float32)
    prepared2 = prepare_params(params2)
    a2, b2 = latent_predictor(x2, prepared2, block_rows=16)
    jax.block_until_ready((a2, b2))
    a2_ref, b2_ref = reference(x2, params2)
    assert a2.shape == (B2, HID_DIM) and b2.shape == (B2, CODE_DIM)
    assert jnp.allclose(a2, a2_ref, **TOL)
    assert jnp.allclose(b2, b2_ref, **TOL)

    print("KERNEL_OK")
</pallas_src>

<mosaic_0001>
module attributes {stable_mosaic.version = 11 : i64} {
  func.func @stats_matmul_kernel(%arg0: i32, %arg1: memref<8x1024xf32, #tpu.memory_space<vmem>>, %arg2: memref<1024x128xbf16, #tpu.memory_space<vmem>>, %arg3: memref<8x128xf32, #tpu.memory_space<vmem>>, %arg4: memref<1x2x128xf32, #tpu.memory_space<vmem>>) attributes {dimension_semantics = [#tpu.dimension_semantics<parallel>], iteration_bounds = array<i64: 1>, scalar_prefetch = 0 : i64, scratch_operands = 0 : i64, tpu.core_type = #tpu.core_type<tc>, window_params = [{transform_indices = @transform_0, window_bounds = array<i64: 8, 1024>}, {pipeline_mode = #tpu.pipeline_mode<synchronous>, transform_indices = @transform_1, window_bounds = array<i64: 1024, 128>}, {transform_indices = @transform_2, window_bounds = array<i64: 8, 128>}, {transform_indices = @transform_3, window_bounds = array<i64: 1, 2, 128>}]} {
    %c0 = arith.constant 0 : index
    %c0_0 = arith.constant 0 : index
    %0 = vector.load %arg1[%c0, %c0_0] : memref<8x1024xf32, #tpu.memory_space<vmem>>, vector<8x1024xf32>
    %1 = arith.truncf %0 : vector<8x1024xf32> to vector<8x1024xbf16>
    %c0_1 = arith.constant 0 : index
    %c0_2 = arith.constant 0 : index
    %2 = vector.load %arg2[%c0_1, %c0_2] : memref<1024x128xbf16, #tpu.memory_space<vmem>>, vector<1024x128xbf16>
    %cst = arith.constant dense<0.000000e+00> : vector<8x128xf32>
    %3 = tpu.matmul %1, %2, %cst {dimension_numbers = #tpu.dot_dimension_numbers<[1], [0], [0], [1], [0, 0, 1, 1], [], []>} : vector<8x1024xbf16>, vector<1024x128xbf16>, vector<8x128xf32> -> vector<8x128xf32>
    %c0_3 = arith.constant 0 : index
    %c0_4 = arith.constant 0 : index
    %4 = vector.load %arg3[%c0_3, %c0_4] : memref<8x128xf32, #tpu.memory_space<vmem>>, vector<8x128xf32>
    tpu.vector_store %arg3[%c0_3, %c0_4], %3 {strides = array<i32>} : memref<8x128xf32, #tpu.memory_space<vmem>>, vector<8x128xf32>,
    %cst_5 = arith.constant dense<0.000000e+00> : vector<128xf32>
    %5 = vector.multi_reduction <add>, %3, %cst_5 [0] : vector<8x128xf32> to vector<128xf32>
    %6 = vector.shape_cast %5 : vector<128xf32> to vector<1x128xf32>
    %c0_6 = arith.constant 0 : index
    %c0_7 = arith.constant 0 : index
    %c0_8 = arith.constant 0 : index
    %7 = vector.load %arg4[%c0_6, %c0_7, %c0_8] : memref<1x2x128xf32, #tpu.memory_space<vmem>>, vector<1x1x128xf32>
    %8 = vector.shape_cast %7 : vector<1x1x128xf32> to vector<1x128xf32>
    %9 = vector.shape_cast %6 : vector<1x128xf32> to vector<1x1x128xf32>
    tpu.vector_store %arg4[%c0_6, %c0_7, %c0_8], %9 {strides = array<i32>} : memref<1x2x128xf32, #tpu.memory_space<vmem>>, vector<1x1x128xf32>,
    %10 = arith.mulf %3, %3 : vector<8x128xf32>
    %cst_9 = arith.constant dense<0.000000e+00> : vector<128xf32>
    %11 = vector.multi_reduction <add>, %10, %cst_9 [0] : vector<8x128xf32> to vector<128xf32>
    %12 = vector.shape_cast %11 : vector<128xf32> to vector<1x128xf32>
    %c0_10 = arith.constant 0 : index
    %c1 = arith.constant 1 : index
    %c0_11 = arith.constant 0 : index
    %13 = vector.load %arg4[%c0_10, %c1, %c0_11] : memref<1x2x128xf32, #tpu.memory_space<vmem>>, vector<1x1x128xf32>
    %14 = vector.shape_cast %13 : vector<1x1x128xf32> to vector<1x128xf32>
    %15 = vector.shape_cast %12 : vector<1x128xf32> to vector<1x1x128xf32>
    tpu.vector_store %arg4[%c0_10, %c1, %c0_11], %15 {strides = array<i32>} : memref<1x2x128xf32, #tpu.memory_space<vmem>>, vector<1x1x128xf32>,
    return
  }
  func.func @transform_0(%arg0: i32) -> (i32, i32) {
    %c0_i32 = arith.constant 0 : i32
    %c0_i32_0 = arith.constant 0 : i32
    return %arg0, %c0_i32 : i32, i32
  }
  func.func @transform_1(%arg0: i32) -> (i32, i32) {
    %c0_i32 = arith.constant 0 : i32
    %c0_i32_0 = arith.constant 0 : i32
    %c0_i32_1 = arith.constant 0 : i32
    return %c0_i32, %c0_i32_0 : i32, i32
  }
  func.func @transform_2(%arg0: i32) -> (i32, i32) {
    %c0_i32 = arith.constant 0 : i32
    %c0_i32_0 = arith.constant 0 : i32
    return %arg0, %c0_i32 : i32, i32
  }
  func.func @transform_3(%arg0: i32) -> (i32, i32, i32) {
    %c0_i32 = arith.constant 0 : i32
    %c0_i32_0 = arith.constant 0 : i32
    %c0_i32_1 = arith.constant 0 : i32
    return %arg0, %c0_i32, %c0_i32_0 : i32, i32, i32
  }
}

</mosaic_0001>

<bundles_post_ra>
// kernel: tpu_custom_call.1
= control target key start
LH: loop header
LB: loop body
LE: loop exit
PB: predicated region body
PF: predicated region fallthrough
CT: control target
= control target key end

     0   :  { %9 = vsyncpa [#allocation3], 0  ;;  %s1175_s0 = inlined_call_operand.hbm [shape: f32[8,1024], index: 0, kind: input, shape index: {}]   ;;  %s1176_s1 = inlined_call_operand.hbm [shape: bf16[1024,128], index: 1, kind: input, shape index: {}]   ;;  %s1177_s2 = inlined_call_operand.hbm [shape: f32[8,128], index: 2, kind: output, shape index: {0}]   ;;  %s1178_s3 = inlined_call_operand.hbm [shape: f32[1,2,128], index: 3, kind: output, shape index: {1}]  }
   0x1   :  { %10 = vsyncpa [#allocation6], 0 }
   0x2   :  { %11 = vsyncpa [#allocation4], 0 }
   0x3   :  { %12 = vsyncpa [#allocation9], 0  ;;  %s1094_s12 = smov [#allocation2]   ;;  %s1095_s14 = smov [#allocation5]  }
   0x4   :  { %s19_s13 = sshll.u32 %s1094_s12, 4  ;;  %s28_s15 = sshll.u32 %s1095_s14, 4  ;;  %s20_s13 = int_to_ptr.vmem [resolvable:$true] %s19_s13  ;;  %s1120_s15 = int_to_ptr.vmem [resolvable:$true] %s28_s15 }
   0x5   :  { %s998_s18 = scalar_lea.hbm %s1175_s0, 1024 }
   0x6   :  { %p999_p0 = scmp.ne.s32.totalorder %s1175_s0, %s998_s18  ;;  %p1002_p1 = scmp.lt.u32.totalorder %s998_s18, %s1175_s0 }
   0x8   :  { %p1004_p2 = pnand %p1002_p1, %p999_p0 }
   0xa   :  { %1007 = shalt.err (!%p1004_p2)
}
   0xb   :  { %s1008_s23 = scalar_lea.vmem %s20_s13, 1024  ;;  %p1013_p4 = scmp.lt.s32.totalorder %s20_s13, %s20_s13 }
   0xc   :  { %p1009_p3 = scmp.ne.s32.totalorder %s20_s13, %s1008_s23  ;;  %p1014_p5 = scmp.lt.s32.totalorder %s1008_s23, %s1008_s23 }
   0xe   :  { %p1015_p6 = por %p1014_p5, %p1013_p4 }
  0x10   :  { %p1016_p7 = pnand %p1015_p6, %p1009_p3 }
  0x12   :  { %1019 = shalt.err (!%p1016_p7)
}
  0x13   :  { %22 = dma.hbm_to_vmem [thread:$0]  %s1175_s0, 1024, %s20_s13, [#allocation3]  }
  0x14   :  { %s1020_s28 = scalar_lea.hbm %s1176_s1, 8192 }
  0x15   :  { %p1021_p8 = scmp.ne.s32.totalorder %s1176_s1, %s1020_s28  ;;  %p1024_p9 = scmp.lt.u32.totalorder %s1020_s28, %s1176_s1 }
  0x17   :  { %p1026_p10 = pnand %p1024_p9, %p1021_p8 }
  0x19   :  { %1029 = shalt.err (!%p1026_p10)
}
  0x1a   :  { %s1030_s6 = scalar_lea.vmem %s1120_s15, 8192  ;;  %p1035_p12 = scmp.lt.s32.totalorder %s1120_s15, %s1120_s15 }
  0x1b   :  { %p1031_p11 = scmp.ne.s32.totalorder %s1120_s15, %s1030_s6  ;;  %p1036_p13 = scmp.lt.s32.totalorder %s1030_s6, %s1030_s6 }
  0x1d   :  { %p1037_p0 = por %p1036_p13, %p1035_p12 }
  0x1f   :  { %p1038_p1 = pnand %p1037_p0, %p1031_p11 }
  0x21   :  { %1041 = shalt.err (!%p1038_p1)
}
  0x22   :  { %s1096_s0 = smov 64   ;;  %s1097_s7 = smov 4  }
  0x23   :  { %34 = dma.hbm_to_vmem [thread:$0]  %s1176_s1, 8192, %s1120_s15, [#allocation6], %s1096_s0, %s1096_s0, %s1097_s7  }
  0x24   :  { %1086 = dma.done.wait [#allocation3], 1024  }
  0x25   :  { %1087 = vsyncadd [#allocation3], 4294966272 }
  0x26   :  { %1088 = dma.done.wait [#allocation6], 8192  }
  0x27   :  { %1089 = vsyncadd [#allocation6], 4294959104  ;;  %v934_v0 = vld [vmem:[#allocation5 + $0x40] sm:$0xff]   ;;  %v938_v4 = vld [vmem:[#allocation5 + $0x48] sm:$0xff]   ;;  %s1098_s1 = smov [#allocation7]  }
  0x28   :  { %v935_v1 = vld [vmem:[#allocation5 + $0xc0] sm:$0xff]   ;;  %840 = vmatprep.subr.bf16.mxu0 %v934_v0  ;;  %v939_v5 = vld [vmem:[#allocation5 + $0xc8] sm:$0xff]   ;;  %v942_v8 = vld [vmem:[#allocation5 + $0x50] sm:$0xff]   ;;  %s752_s10 = sshll.u32 %s1098_s1, 4  ;;  %s753_s10 = int_to_ptr.vmem [resolvable:$true] %s752_s10 }
  0x29   :  { %v936_v2 = vld [vmem:[#allocation5] sm:$0xff]   ;;  %862 = vmatprep.subr.bf16.mxu1 %v935_v1  ;;  %v940_v6 = vld [vmem:[#allocation5 + $0x8] sm:$0xff]   ;;  %v943_v9 = vld [vmem:[#allocation5 + $0xd0] sm:$0xff]   ;;  %s1042_s11 = scalar_lea.vmem %s753_s10, 128  ;;  %p1047_p3 = scmp.lt.s32.totalorder %s753_s10, %s753_s10 }
  0x2a   :  { %v937_v3 = vld [vmem:[#allocation5 + $0x80] sm:$0xff]   ;;  %841 = vmatpush3.bf16.msra.mxu0 %v936_v2  ;;  %v941_v7 = vld [vmem:[#allocation5 + $0x88] sm:$0xff]   ;;  %v944_v10 = vld [vmem:[#allocation5 + $0x10] sm:$0xff]   ;;  %p1043_p2 = scmp.ne.s32.totalorder %s753_s10, %s1042_s11  ;;  %p1048_p4 = scmp.lt.s32.totalorder %s1042_s11, %s1042_s11 }
  0x2b   :  { %863 = vmatpush3.bf16.msra.mxu1 %v937_v3  ;;  %842 = vmatprep.subr.bf16.mxu0 %v938_v4  ;;  %v945_v11 = vld [vmem:[#allocation5 + $0x90] sm:$0xff]   ;;  %v946_v12 = vld [vmem:[#allocation5 + $0x58] sm:$0xff]   ;;  %v950_v16 = vld [vmem:[#allocation5 + $0x60] sm:$0xff]  }
  0x2c   :  { %864 = vmatprep.subr.bf16.mxu1 %v939_v5  ;;  %v947_v13 = vld [vmem:[#allocation5 + $0xd8] sm:$0xff]   ;;  %v951_v17 = vld [vmem:[#allocation5 + $0xe0] sm:$0xff]   ;;  %v954_v20 = vld [vmem:[#allocation5 + $0x68] sm:$0xff]   ;;  %p1049_p5 = por %p1048_p4, %p1047_p3 }
  0x2d   :  { %v948_v14 = vld [vmem:[#allocation5 + $0x18] sm:$0xff]   ;;  %v952_v18 = vld [vmem:[#allocation5 + $0x20] sm:$0xff]   ;;  %v955_v21 = vld [vmem:[#allocation5 + $0xe8] sm:$0xff]  }
  0x2e   :  { %843 = vmatpush3.bf16.msra.mxu0 %v940_v6  ;;  %v949_v15 = vld [vmem:[#allocation5 + $0x98] sm:$0xff]   ;;  %v953_v19 = vld [vmem:[#allocation5 + $0xa0] sm:$0xff]   ;;  %v956_v22 = vld [vmem:[#allocation5 + $0x28] sm:$0xff]   ;;  %p1050_p6 = pnand %p1049_p5, %p1043_p2 }
  0x2f   :  { %865 = vmatpush3.bf16.msra.mxu1 %v941_v7  ;;  %844 = vmatprep.subr.bf16.mxu0 %v942_v8  ;;  %v957_v23 = vld [vmem:[#allocation5 + $0xa8] sm:$0xff]   ;;  %v958_v24 = vld [vmem:[#allocation5 + $0x70] sm:$0xff]   ;;  %v962_v28 = vld [vmem:[#allocation5 + $0x78] sm:$0xff]  }
  0x30   :  { %866 = vmatprep.subr.bf16.mxu1 %v943_v9  ;;  %v959_v25 = vld [vmem:[#allocation5 + $0xf0] sm:$0xff]   ;;  %v963_v29 = vld [vmem:[#allocation5 + $0xf8] sm:$0xff]   ;;  %v43_v32 = vld [vmem:[#allocation2 + $0x8] sm:$0xff] }
  0x31   :  { %v960_v26 = vld [vmem:[#allocation5 + $0x30] sm:$0xff]   ;;  %v964_v30 = vld [vmem:[#allocation5 + $0x38] sm:$0xff]   ;;  %v42_v34 = vld [vmem:[#allocation2] sm:$0xff]  ;;  %v51_v35 = vpack.c.bf16 %v43_v32, %v43_v32 }
  0x32   :  { %845 = vmatpush3.bf16.msra.mxu0 %v944_v10  ;;  %v961_v27 = vld [vmem:[#allocation5 + $0xb0] sm:$0xff]   ;;  %v965_v31 = vld [vmem:[#allocation5 + $0xb8] sm:$0xff]   ;;  %v50_v37 = vpack.c.bf16 %v42_v34, %v42_v34  ;;  %v966_v40 = vld [vmem:[#allocation5 + $0x140] sm:$0xff]  }
  0x33   :  { %867 = vmatpush3.bf16.msra.mxu1 %v945_v11  ;;  %846 = vmatprep.subr.bf16.mxu0 %v946_v12  ;;  %v45_v33 = vld [vmem:[#allocation2 + $0x18] sm:$0xff]  ;;  %v44_v38 = vld [vmem:[#allocation2 + $0x10] sm:$0xff]  ;;  %v967_v41 = vld [vmem:[#allocation5 + $0x1c0] sm:$0xff]  }
  0x34   :  { %868 = vmatprep.subr.bf16.mxu1 %v947_v13  ;;  %v53_v36 = vpack.c.bf16 %v45_v33, %v45_v33  ;;  %v52_v39 = vpack.c.bf16 %v44_v38, %v44_v38  ;;  %602 = vmatprep.mubr.bf16.mxu0 %v51_v35  ;;  %v968_v42 = vld [vmem:[#allocation5 + $0x100] sm:$0xff]   ;;  %v970_v44 = vld [vmem:[#allocation5 + $0x148] sm:$0xff]   ;;  %v974_v48 = vld [vmem:[#allocation5 + $0x150] sm:$0xff]  }
  0x35   :  { %v969_v43 = vld [vmem:[#allocation5 + $0x180] sm:$0xff]   ;;  %v971_v45 = vld [vmem:[#allocation5 + $0x1c8] sm:$0xff]   ;;  %v975_v49 = vld [vmem:[#allocation5 + $0x1d0] sm:$0xff]  }
  0x36   :  { %847 = vmatpush3.bf16.msra.mxu0 %v948_v14  ;;  %642 = vmatprep.mubr.bf16.mxu1 %v53_v36  ;;  %v972_v46 = vld [vmem:[#allocation5 + $0x108] sm:$0xff]   ;;  %v976_v50 = vld [vmem:[#allocation5 + $0x110] sm:$0xff]   ;;  %v978_v52 = vld [vmem:[#allocation5 + $0x158] sm:$0xff]  }
  0x37   :  { %869 = vmatpush3.bf16.msra.mxu1 %v949_v15  ;;  %848 = vmatprep.subr.bf16.mxu0 %v950_v16  ;;  %v973_v47 = vld [vmem:[#allocation5 + $0x188] sm:$0xff]   ;;  %v977_v51 = vld [vmem:[#allocation5 + $0x190] sm:$0xff]   ;;  %v979_v53 = vld [vmem:[#allocation5 + $0x1d8] sm:$0xff]  }
  0x38   :  { %870 = vmatprep.subr.bf16.mxu1 %v951_v17  ;;  %v980_v54 = vld [vmem:[#allocation5 + $0x118] sm:$0xff]   ;;  %v982_v56 = vld [vmem:[#allocation5 + $0x160] sm:$0xff]   ;;  %v986_v60 = vld [vmem:[#allocation5 + $0x168] sm:$0xff]  }
  0x39   :  { %v981_v55 = vld [vmem:[#allocation5 + $0x198] sm:$0xff]   ;;  %v983_v57 = vld [vmem:[#allocation5 + $0x1e0] sm:$0xff]   ;;  %v987_v61 = vld [vmem:[#allocation5 + $0x1e8] sm:$0xff]  }
  0x3a   :  { %849 = vmatpush3.bf16.msra.mxu0 %v952_v18  ;;  %v984_v58 = vld [vmem:[#allocation5 + $0x120] sm:$0xff]   ;;  %v988_v62 = vld [vmem:[#allocation5 + $0x128] sm:$0xff]   ;;  %v990_v0 = vld [vmem:[#allocation5 + $0x170] sm:$0xff]  }
  0x3b   :  { %871 = vmatpush3.bf16.msra.mxu1 %v953_v19  ;;  %850 = vmatprep.subr.bf16.mxu0 %v954_v20  ;;  %v985_v59 = vld [vmem:[#allocation5 + $0x1a0] sm:$0xff]   ;;  %v989_v63 = vld [vmem:[#allocation5 + $0x1a8] sm:$0xff]   ;;  %v991_v1 = vld [vmem:[#allocation5 + $0x1f0] sm:$0xff]  }
  0x3c   :  { %872 = vmatprep.subr.bf16.mxu1 %v955_v21  ;;  %v992_v2 = vld [vmem:[#allocation5 + $0x130] sm:$0xff]   ;;  %v994_v4 = vld [vmem:[#allocation5 + $0x178] sm:$0xff]   ;;  %v47_v8 = vld [vmem:[#allocation2 + $0x28] sm:$0xff] }
  0x3d   :  { %v993_v3 = vld [vmem:[#allocation5 + $0x1b0] sm:$0xff]   ;;  %v995_v5 = vld [vmem:[#allocation5 + $0x1f8] sm:$0xff]   ;;  %v55_v10 = vpack.c.bf16 %v47_v8, %v47_v8  ;;  %v46_v12 = vld [vmem:[#allocation2 + $0x20] sm:$0xff] }
  0x3e   :  { %851 = vmatpush3.bf16.msra.mxu0 %v956_v22  ;;  %v996_v6 = vld [vmem:[#allocation5 + $0x138] sm:$0xff]   ;;  %v48_v13 = vld [vmem:[#allocation2 + $0x30] sm:$0xff]  ;;  %v54_v14 = vpack.c.bf16 %v46_v12, %v46_v12 }
  0x3f   :  { %873 = vmatpush3.bf16.msra.mxu1 %v957_v23  ;;  %852 = vmatprep.subr.bf16.mxu0 %v958_v24  ;;  %v997_v7 = vld [vmem:[#allocation5 + $0x1b8] sm:$0xff]   ;;  %v56_v15 = vpack.c.bf16 %v48_v13, %v48_v13 }
  0x40   :  { %874 = vmatprep.subr.bf16.mxu1 %v959_v25  ;;  %v49_v9 = vld [vmem:[#allocation2 + $0x38] sm:$0xff] }
  0x41   :  { %v57_v11 = vpack.c.bf16 %v49_v9, %v49_v9 }
  0x42   :  { %853 = vmatpush3.bf16.msra.mxu0 %v960_v26 }
  0x43   :  { %875 = vmatpush3.bf16.msra.mxu1 %v961_v27  ;;  %854 = vmatprep.subr.bf16.mxu0 %v962_v28 }
  0x44   :  { %876 = vmatprep.subr.bf16.mxu1 %v963_v29 }
  0x46   :  { %855 = vmatpush3.bf16.msra.mxu0 %v964_v30 }
  0x47   :  { %877 = vmatpush3.bf16.msra.mxu1 %v965_v31  ;;  %884 = vmatprep.subr.bf16.mxu0 %v966_v40 }
  0x48   :  { %906 = vmatprep.subr.bf16.mxu1 %v967_v41 }
  0x49   :  { %603 = vmatmul.mubr.bf16.vlgmr.msra.gmra.mrb[0].mxu0 %v50_v37 }
  0x4a   :  { %643 = vmatmul.mubr.bf16.vlgmr.msra.gmra.mrb[0].mxu1 %v52_v39  ;;  %885 = vmatpush3.bf16.msra.mxu0 %v968_v42 }
  0x4b   :  { %907 = vmatpush3.bf16.msra.mxu1 %v969_v43  ;;  %886 = vmatprep.subr.bf16.mxu0 %v970_v44 }
  0x4c   :  { %908 = vmatprep.subr.bf16.mxu1 %v971_v45  ;;  %682 = vmatprep.mubr.bf16.mxu0 %v55_v10 }
  0x4d   :  { %722 = vmatprep.mubr.bf16.mxu1 %v57_v11 }
  0x4e   :  { %887 = vmatpush3.bf16.msra.mxu0 %v972_v46 }
  0x4f   :  { %909 = vmatpush3.bf16.msra.mxu1 %v973_v47  ;;  %888 = vmatprep.subr.bf16.mxu0 %v974_v48 }
  0x50   :  { %910 = vmatprep.subr.bf16.mxu1 %v975_v49 }
  0x52   :  { %889 = vmatpush3.bf16.msra.mxu0 %v976_v50 }
  0x53   :  { %911 = vmatpush3.bf16.msra.mxu1 %v977_v51  ;;  %890 = vmatprep.subr.bf16.mxu0 %v978_v52 }
  0x54   :  { %912 = vmatprep.subr.bf16.mxu1 %v979_v53 }
  0x56   :  { %891 = vmatpush3.bf16.msra.mxu0 %v980_v54 }
  0x57   :  { %913 = vmatpush3.bf16.msra.mxu1 %v981_v55  ;;  %892 = vmatprep.subr.bf16.mxu0 %v982_v56 }
  0x58   :  { %914 = vmatprep.subr.bf16.mxu1 %v983_v57 }
  0x5a   :  { %893 = vmatpush3.bf16.msra.mxu0 %v984_v58 }
  0x5b   :  { %915 = vmatpush3.bf16.msra.mxu1 %v985_v59  ;;  %894 = vmatprep.subr.bf16.mxu0 %v986_v60 }
  0x5c   :  { %916 = vmatprep.subr.bf16.mxu1 %v987_v61 }
  0x5e   :  { %895 = vmatpush3.bf16.msra.mxu0 %v988_v62 }
  0x5f   :  { %917 = vmatpush3.bf16.msra.mxu1 %v989_v63  ;;  %896 = vmatprep.subr.bf16.mxu0 %v990_v0 }
  0x60   :  { %918 = vmatprep.subr.bf16.mxu1 %v991_v1 }
  0x62   :  { %897 = vmatpush3.bf16.msra.mxu0 %v992_v2 }
  0x63   :  { %919 = vmatpush3.bf16.msra.mxu1 %v993_v3  ;;  %898 = vmatprep.subr.bf16.mxu0 %v994_v4 }
  0x64   :  { %920 = vmatprep.subr.bf16.mxu1 %v995_v5 }
  0x66   :  { %899 = vmatpush3.bf16.msra.mxu0 %v996_v6 }
  0x67   :  { %921 = vmatpush3.bf16.msra.mxu1 %v997_v7 }
  0x69   :  { %683 = vmatmul.mubr.bf16.vlgmr.msra.gmra.mrb[4].mxu0 %v54_v14 }
  0x6a   :  { %723 = vmatmul.mubr.bf16.vlgmr.msra.gmra.mrb[4].mxu1 %v56_v15 }
 0x11c   :  { %v856_v16 = vpop.f32.mrb[0].mxu0 }
 0x11d   :  { %v878_v17 = vpop.f32.mrb[0].mxu1  ;;  %v857_v18 = vpop.f32.mrb[1].mxu0 }
 0x11e   :  { %v879_v19 = vpop.f32.mrb[1].mxu1  ;;  %v858_v20 = vadd.f32 %v857_v18, %v856_v16  ;;  %v859_v22 = vpop.f32.mrb[2].mxu0 }
 0x11f   :  { %v880_v21 = vadd.f32 %v879_v19, %v878_v17  ;;  %v881_v23 = vpop.f32.mrb[2].mxu1  ;;  %v860_v24 = vpop.f32.mrb[3].mxu0 }
 0x120   :  { %v882_v25 = vpop.f32.mrb[3].mxu1 }
 0x121   :  { %v645_v26 = vadd.f32 %v880_v21, %v858_v20 }
 0x13c   :  { %v900_v27 = vpop.f32.mrb[4].mxu0 }
 0x13d   :  { %v922_v28 = vpop.f32.mrb[4].mxu1  ;;  %v901_v29 = vpop.f32.mrb[5].mxu0 }
 0x13e   :  { %v902_v30 = vadd.f32 %v901_v29, %v900_v27  ;;  %v923_v31 = vpop.f32.mrb[5].mxu1  ;;  %v903_v32 = vpop.f32.mrb[6].mxu0 }
 0x13f   :  { %v924_v33 = vadd.f32 %v923_v31, %v922_v28  ;;  %v925_v34 = vpop.f32.mrb[6].mxu1  ;;  %v904_v35 = vpop.f32.mrb[7].mxu0 }
 0x140   :  { %v685_v36 = vadd.f32 %v902_v30, %v645_v26  ;;  %v926_v37 = vpop.f32.mrb[7].mxu1 }
 0x142   :  { %v725_v38 = vadd.f32 %v924_v33, %v685_v36 }
 0x144   :  { %v731_v39 = vrot.slane %v725_v38, 4  ;;  %v738_v40 = vmul.f32 %v725_v38, %v725_v38  ;;  %730 = vst [vmem:[#allocation7] sm:$0xff] %v725_v38 }
 0x145   :  { %1053 = shalt.err (!%p1050_p6)
}
 0x146   :  { %s1054_s14 = scalar_lea.hbm %s1177_s2, 128 }
 0x147   :  { %p1055_p7 = scmp.ne.s32.totalorder %s1177_s2, %s1054_s14  ;;  %p1058_p8 = scmp.lt.u32.totalorder %s1054_s14, %s1177_s2 }
 0x149   :  { %p1060_p9 = pnand %p1058_p8, %p1055_p7 }
 0x14b   :  { %1063 = shalt.err (!%p1060_p9)
}
 0x14c   :  { %755 = dma.vmem_to_hbm [thread:$0]  %s753_s10, 128, %s1177_s2, [#allocation4]   ;;  %v732_v41 = vadd.f32 %v731_v39, %v725_v38  ;;  %v739_v42 = vrot.slane %v738_v40, 4 }
 0x14d   :  { %s1099_s21 = smov [#allocation8]  }
 0x14e   :  { %v733_v43 = vrot.slane %v732_v41, 2  ;;  %v740_v44 = vadd.f32 %v739_v42, %v738_v40  ;;  %s762_s22 = sshll.u32 %s1099_s21, 4  ;;  %s763_s22 = int_to_ptr.vmem [resolvable:$true] %s762_s22 }
 0x14f   :  { %s1064_s23 = scalar_lea.vmem %s763_s22, 32  ;;  %p1069_p11 = scmp.lt.s32.totalorder %s763_s22, %s763_s22 }
 0x150   :  { %v734_v45 = vadd.f32 %v733_v43, %v732_v41  ;;  %v741_v46 = vrot.slane %v740_v44, 2  ;;  %p1065_p10 = scmp.ne.s32.totalorder %s763_s22, %s1064_s23  ;;  %p1070_p12 = scmp.lt.s32.totalorder %s1064_s23, %s1064_s23 }
 0x152   :  { %v735_v47 = vrot.slane %v734_v45, 1  ;;  %v742_v48 = vadd.f32 %v741_v46, %v740_v44  ;;  %p1071_p13 = por %p1070_p12, %p1069_p11 }
 0x154   :  { %v736_v49 = vadd.f32 %v735_v47, %v734_v45  ;;  %v743_v50 = vrot.slane %v742_v48, 1  ;;  %p1072_p0 = pnand %p1071_p13, %p1065_p10 }
 0x156   :  { %737 = vst [vmem:[#allocation8] sm:$0x1] %v736_v49  ;;  %v744_v51 = vadd.f32 %v743_v50, %v742_v48 }
 0x158   :  { %745 = vst [vmem:[#allocation8 + $0x1] sm:$0x1] %v744_v51 }
 0x159   :  { %1075 = shalt.err (!%p1072_p0)
}
 0x15a   :  { %s1076_s25 = scalar_lea.hbm %s1178_s3, 32 }
 0x15b   :  { %p1077_p1 = scmp.ne.s32.totalorder %s1178_s3, %s1076_s25  ;;  %p1080_p2 = scmp.lt.u32.totalorder %s1076_s25, %s1178_s3 }
 0x15d   :  { %p1082_p3 = pnand %p1080_p2, %p1077_p1 }
 0x15f   :  { %1085 = shalt.err (!%p1082_p3)
}
 0x160   :  { %765 = dma.vmem_to_hbm [thread:$0]  %s763_s22, 32, %s1178_s3, [#allocation9]  }
 0x161   :  { %1090 = dma.done.wait [#allocation4], 128  }
 0x162   :  { %1091 = vsyncadd [#allocation4], 4294967168 }
 0x163   :  { %1092 = dma.done.wait [#allocation9], 32  }
 0x164   :  { %1093 = vsyncadd [#allocation9], 4294967264 }
 0x165   :  { %772 = vsyncpa [#allocation3], 1 }
 0x166   :  { %773 = vsyncpa [#allocation6], 1 }
 0x167   :  { %774 = vsyncpa [#allocation4], 1 }
 0x168   :  { %775 = vsyncpa [#allocation9], 1 }

</bundles_post_ra>
